<compile_context>
chip_gen: v7x
topology: tpu7x:2x2x1
jax: 0.10.0
libtpu: 0.0.40
codegen_flags: <defaults>
</compile_context>

<pallas_src>
import functools

import jax
import jax.numpy as jnp
from jax import lax
from jax.experimental import pallas as pl
from jax.experimental.pallas import tpu as pltpu

LANE = 128


def _round_up(n, m):
    return ((n + m - 1) // m) * m


def _pick_batch_tile(batch, seq_len):
    """Samples per grid step: amortize per-step overhead when L is short, but keep
    >= 2 grid steps whenever batch >= 2 so both v7x TensorCores get work."""
    target = max(1, 512 // max(seq_len, 1))
    divisors = [d for d in range(1, batch + 1) if batch % d == 0]
    bt = max([d for d in divisors if d <= target] or [1])
    while bt > 1 and batch // bt < 2:
        bt = max([d for d in divisors if d < bt] or [1])
    return bt


# ----------------------------- Pallas kernel ------------------------------- #

def _causal_shift(v, shift):
    """shifted[t] = v[t - shift] (zeros for t < shift), built with an XLU sublane roll
    plus a VPU select: no VMEM scratch, no masked sublane stores."""
    if shift == 0:
        return v
    rolled = pltpu.roll(v, shift=shift, axis=0)            # rolled[t] = v[(t - shift) % L]
    t_idx = lax.broadcasted_iota(jnp.int32, v.shape, 0)
    return jnp.where(t_idx >= shift, rolled, jnp.zeros_like(rolled))


def _causal_conv(v, w_ref, b_ref, K, dil):
    """Causal dilated conv as K accumulating MXU matmuls on shifted register views.

    v: (L, C) f32;  w_ref: (K, C, C_out) VMEM;  b_ref: (1, C_out) f32.
    Returns (L, C_out) f32 (bias added, no activation).
    """
    L = v.shape[0]
    acc = None
    for j in range(K):
        s = (K - 1 - j) * dil
        if s >= L:                       # this tap only ever sees the zero left-padding
            continue
        tap = _causal_shift(v, s).astype(w_ref.dtype)
        term = jnp.dot(tap, w_ref[j], preferred_element_type=jnp.float32)
        acc = term if acc is None else acc + term
    if acc is None:
        acc = jnp.zeros((L, w_ref.shape[-1]), jnp.float32)
    return acc + b_ref[...]


def _temporal_block_kernel(x_ref, w1_ref, b1_ref, w2_ref, b2_ref, *rest,
                           K, dil, has_ds, has_head, b_tile):
    """Fused TemporalBlock: conv1+ReLU -> conv2+ReLU -> residual(+1x1) -> ReLU for a
    small batch tile; optionally fuses the last-time-step Linear head."""
    rest = list(rest)
    if has_ds:
        wd_ref, bd_ref = rest[0], rest[1]
        rest = rest[2:]
    if has_head:
        lw_ref, lb_ref = rest[0], rest[1]
        rest = rest[2:]
    (out_ref,) = rest

    for bt in range(b_tile):                               # unrolled; all ops stay 2-D
        x = x_ref[bt]                                      # (L, C_in) f32
        h = jnp.maximum(_causal_conv(x, w1_ref, b1_ref, K, dil), 0.0)
        y = jnp.maximum(_causal_conv(h, w2_ref, b2_ref, K, dil), 0.0)
        # TODO(synk): dropout layers are inference-mode identity (no RNG mask).
        if has_ds:
            res = jnp.dot(x.astype(wd_ref.dtype), wd_ref[...],
                          preferred_element_type=jnp.float32) + bd_ref[...]
        else:
            res = x
        act = jnp.maximum(y + res, 0.0)                    # (L, C_out_p)
        if has_head:
            last = act[act.shape[0] - 1:, :]               # (1, C_out_p): only row the head uses
            o = jnp.dot(last.astype(lw_ref.dtype), lw_ref[...],
                        preferred_element_type=jnp.float32) + lb_ref[...]
            out_ref[bt] = o.astype(out_ref.dtype)          # (1, O_p) lane-dense row
        else:
            out_ref[bt] = act.astype(out_ref.dtype)


# ------------------------------ Pallas wrapper ------------------------------ #

_WHOLE_VMEM = pl.BlockSpec(memory_space=pltpu.MemorySpace.VMEM)   # resident, single copy


def temporal_block(x, blk, head=None):
    """x: (B, L, C_in). Returns (B, L, C_out_p), or (B, 1, O_p) when `head` is fused."""
    B, L, Cin = x.shape
    K, dil = blk["kernel_size"], blk["dilation"]
    Cout = blk["cout_p"]
    has_ds = blk["wd"] is not None
    has_head = head is not None

    b_tile = _pick_batch_tile(B, L)
    grid = (B // b_tile,)

    weights = [blk["w1"], blk["b1"], blk["w2"], blk["b2"]]
    if has_ds:
        weights += [blk["wd"], blk["bd"]]
    if has_head:
        weights += [head[0], head[1]]

    if has_head:
        O = head[0].shape[1]
        out_shape = jax.ShapeDtypeStruct((B, 1, O), jnp.float32)
        out_spec = pl.BlockSpec((b_tile, 1, O), lambda b: (b, 0, 0))
        out_block = b_tile * O
    else:
        out_shape = jax.ShapeDtypeStruct((B, L, Cout), jnp.float32)
        out_spec = pl.BlockSpec((b_tile, L, Cout), lambda b: (b, 0, 0))
        out_block = b_tile * L * Cout

    # Explicit VMEM budget (review item): double-buffered I/O tiles + resident weights
    # + headroom for in-register intermediates / spills; capped at the v7x budget.
    w_bytes = sum(int(w.size) * w.dtype.itemsize for w in weights)
    io_bytes = 4 * (2 * b_tile * L * Cin + 2 * out_block)
    spill_bytes = 4 * 6 * L * max(Cin, Cout)
    vmem_limit = min(2 * (w_bytes + io_bytes + spill_bytes) + (8 << 20), 64 << 20)

    kern = functools.partial(_temporal_block_kernel, K=K, dil=dil, has_ds=has_ds,
                             has_head=has_head, b_tile=b_tile)
    return pl.pallas_call(
        kern,
        grid=grid,
        in_specs=[pl.BlockSpec((b_tile, L, Cin), lambda b: (b, 0, 0))]
                 + [_WHOLE_VMEM] * len(weights),
        out_specs=out_spec,
        out_shape=out_shape,
        compiler_params=pltpu.CompilerParams(
            dimension_semantics=("parallel",),
            vmem_limit_bytes=vmem_limit),
    )(x, *weights)


# ------------------------------- TCN forward -------------------------------- #

def tcn_forward(x_ncl, prepared):
    """x_ncl: (batch, input_channel, seq_len) — PyTorch layout. Returns (batch, output_size)."""
    B, C_in, L = x_ncl.shape
    x = jnp.transpose(x_ncl, (0, 2, 1)).astype(jnp.float32)       # (B, L, C): channels on lanes
    cin0_p = prepared["cin0_p"]
    if cin0_p > C_in:                                             # 8-sublane round-up only (no 128 pad)
        x = jnp.pad(x, ((0, 0), (0, 0), (0, cin0_p - C_in)))
    blocks = prepared["blocks"]
    for i, blk in enumerate(blocks):
        head = (prepared["lin_w"], prepared["lin_b"]) if i == len(blocks) - 1 else None
        x = temporal_block(x, blk, head=head)                     # last block -> (B, 1, O_p)
    return x[:, 0, :prepared["output_size"]]


# ----------------------- parameter prep (done once) ------------------------- #

def prepare_params(params, output_size, compute_dtype=jnp.float32):
    """Pre-transpose / zero-pad / per-tap-split torch-layout weights for the kernels.

    compute_dtype=jnp.bfloat16 enables the optional low-precision MXU path (weights and
    in-kernel activation casts); the default float32 keeps exact reference parity.
    """
    def prep_conv(w_oik, cin_p, cout_p):
        out_ch, in_ch, K = w_oik.shape
        w = jnp.transpose(w_oik, (2, 1, 0))                        # (K, in, out)
        w = jnp.pad(w, ((0, 0), (0, cin_p - in_ch), (0, cout_p - out_ch)))
        return w.astype(compute_dtype)

    def prep_bias(b, cout_p):
        return jnp.pad(b, (0, cout_p - b.shape[0])).reshape(1, cout_p).astype(jnp.float32)

    blocks = []
    in_ch0 = params["blocks"][0]["w1"].shape[1]
    cin_used = _round_up(in_ch0, 8)          # sublane round-up only; no 128-lane HBM pad
    cin0_p = cin_used
    for blk in params["blocks"]:
        out_ch, in_ch, K = blk["w1"].shape
        cout_p = _round_up(out_ch, LANE)
        pb = dict(kernel_size=K, dilation=blk["dilation"], cout_p=cout_p,
                  w1=prep_conv(blk["w1"], cin_used, cout_p),
                  b1=prep_bias(blk["b1"], cout_p),
                  w2=prep_conv(blk["w2"], cout_p, cout_p),
                  b2=prep_bias(blk["b2"], cout_p))
        if blk["wd"] is not None:
            pb["wd"] = prep_conv(blk["wd"], cin_used, cout_p)[0]   # (cin_used, cout_p)
            pb["bd"] = prep_bias(blk["bd"], cout_p)
        elif cin_used != cout_p:
            # n_inputs == n_outputs (no torch downsample) but activation widths differ
            # (narrow first-block input vs lane-padded output): exact 0/1 projection so
            # res == x on the real channels and 0 on the padding lanes.
            eye = jnp.zeros((cin_used, cout_p), jnp.float32)
            eye = eye.at[jnp.arange(in_ch), jnp.arange(in_ch)].set(1.0)
            pb["wd"] = eye.astype(compute_dtype)
            pb["bd"] = jnp.zeros((1, cout_p), jnp.float32)
        else:
            pb["wd"], pb["bd"] = None, None
        blocks.append(pb)
        cin_used = cout_p

    clast_p = blocks[-1]["cout_p"]
    o_p = _round_up(output_size, LANE)
    lin_w = jnp.pad(params["lin_w"],
                    ((0, clast_p - params["lin_w"].shape[0]),
                     (0, o_p - output_size))).astype(compute_dtype)
    lin_b = jnp.pad(params["lin_b"], (0, o_p - output_size)).reshape(1, o_p).astype(jnp.float32)
    return dict(blocks=blocks, lin_w=lin_w, lin_b=lin_b,
                cin0_p=cin0_p, output_size=output_size)


# --------------------------- deterministic params --------------------------- #

def _weight_norm(g, v):
    # effective weight of torch weight_norm (dim=0): g[o] * v[o] / ||v[o]||
    norm = jnp.sqrt(jnp.sum(v * v, axis=(1, 2), keepdims=True))
    return g * v / norm


def make_params(key, input_size, output_size, num_channels, kernel_size):
    blocks = []
    in_ch = input_size
    for i, out_ch in enumerate(num_channels):
        dilation = 2 ** i
        key, k1, k2, k3, k4, k5, k6, k7, k8 = jax.random.split(key, 9)
        v1 = 0.01 * jax.random.normal(k1, (out_ch, in_ch, kernel_size), jnp.float32)
        g1 = 1.0 + 0.1 * jax.random.normal(k2, (out_ch, 1, 1), jnp.float32)
        w1 = _weight_norm(g1, v1)
        b1 = 0.01 * jax.random.normal(k3, (out_ch,), jnp.float32)
        v2 = 0.01 * jax.random.normal(k4, (out_ch, out_ch, kernel_size), jnp.float32)
        g2 = 1.0 + 0.1 * jax.random.normal(k5, (out_ch, 1, 1), jnp.float32)
        w2 = _weight_norm(g2, v2)
        b2 = 0.01 * jax.random.normal(k6, (out_ch,), jnp.float32)
        if in_ch != out_ch:
            wd = 0.01 * jax.random.normal(k7, (out_ch, in_ch, 1), jnp.float32)
            bd = 0.01 * jax.random.normal(k8, (out_ch,), jnp.float32)
        else:
            wd, bd = None, None
        blocks.append(dict(dilation=dilation, w1=w1, b1=b1, w2=w2, b2=b2, wd=wd, bd=bd))
        in_ch = out_ch
    key, kl1, kl2 = jax.random.split(key, 3)
    lin_w = 0.1 * jax.random.normal(kl1, (num_channels[-1], output_size), jnp.float32)
    lin_b = 0.1 * jax.random.normal(kl2, (output_size,), jnp.float32)
    return dict(blocks=blocks, lin_w=lin_w, lin_b=lin_b)


# ------------------------------ pure-JAX reference --------------------------- #

def ref_forward(x_ncl, params):
    def conv(x, w_oik, b, dilation):
        K = w_oik.shape[2]
        p = (K - 1) * dilation
        y = jax.lax.conv_general_dilated(
            x, w_oik, window_strides=(1,), padding=[(p, p)],
            rhs_dilation=(dilation,), dimension_numbers=("NCH", "OIH", "NCH"))
        if p > 0:
            y = y[:, :, :-p]                                # Chomp1d
        return y + b[None, :, None]

    x = x_ncl
    for blk in params["blocks"]:
        d = blk["dilation"]
        h = jax.nn.relu(conv(x, blk["w1"], blk["b1"], d))
        h = jax.nn.relu(conv(h, blk["w2"], blk["b2"], d))
        res = x if blk["wd"] is None else conv(x, blk["wd"], blk["bd"], 1)
        x = jax.nn.relu(h + res)
    y_last = x[:, :, -1]
    return y_last @ params["lin_w"] + params["lin_b"]


# ----------------------------------- main ------------------------------------ #

if __name__ == "__main__":
    B, input_size, seq_len = 2, 4, 16
    num_channels = [8, 8]
    kernel_size = 2
    output_size = 5

    key = jax.random.PRNGKey(0)
    key, kx, kp = jax.random.split(key, 3)
    x = jax.random.normal(kx, (B, input_size, seq_len), jnp.float32)
    params = make_params(kp, input_size, output_size, num_channels, kernel_size)
    prepared = prepare_params(params, output_size)

    out = jax.block_until_ready(tcn_forward(x, prepared))
    ref = jax.block_until_ready(ref_forward(x, params))

    assert out.shape == (B, output_size), out.shape
    assert jnp.allclose(out, ref, atol=1e-5, rtol=1e-5), (out, ref)

    print("KERNEL_OK")
</pallas_src>

<mosaic_0001>
module attributes {stable_mosaic.version = 11 : i64} {
  func.func @_temporal_block_kernel(%arg0: i32, %arg1: memref<1x16x8xf32, #tpu.memory_space<vmem>>, %arg2: memref<2x8x128xf32, #tpu.memory_space<vmem>>, %arg3: memref<1x128xf32, #tpu.memory_space<vmem>>, %arg4: memref<2x128x128xf32, #tpu.memory_space<vmem>>, %arg5: memref<1x128xf32, #tpu.memory_space<vmem>>, %arg6: memref<8x128xf32, #tpu.memory_space<vmem>>, %arg7: memref<1x128xf32, #tpu.memory_space<vmem>>, %arg8: memref<1x16x128xf32, #tpu.memory_space<vmem>>) attributes {dimension_semantics = [#tpu.dimension_semantics<parallel>], iteration_bounds = array<i64: 2>, scalar_prefetch = 0 : i64, scratch_operands = 0 : i64, tpu.core_type = #tpu.core_type<tc>, window_params = [{transform_indices = @transform_0, window_bounds = array<i64: 1, 16, 8>}, {pipeline_mode = #tpu.pipeline_mode<synchronous>, transform_indices = @transform_1, window_bounds = array<i64: 2, 8, 128>}, {pipeline_mode = #tpu.pipeline_mode<synchronous>, transform_indices = @transform_2, window_bounds = array<i64: 1, 128>}, {pipeline_mode = #tpu.pipeline_mode<synchronous>, transform_indices = @transform_3, window_bounds = array<i64: 2, 128, 128>}, {pipeline_mode = #tpu.pipeline_mode<synchronous>, transform_indices = @transform_4, window_bounds = array<i64: 1, 128>}, {pipeline_mode = #tpu.pipeline_mode<synchronous>, transform_indices = @transform_5, window_bounds = array<i64: 8, 128>}, {pipeline_mode = #tpu.pipeline_mode<synchronous>, transform_indices = @transform_6, window_bounds = array<i64: 1, 128>}, {transform_indices = @transform_7, window_bounds = array<i64: 1, 16, 128>}]} {
    %c0 = arith.constant 0 : index
    %c0_0 = arith.constant 0 : index
    %c0_1 = arith.constant 0 : index
    %0 = vector.load %arg1[%c0, %c0_0, %c0_1] : memref<1x16x8xf32, #tpu.memory_space<vmem>>, vector<1x16x8xf32>
    %1 = vector.shape_cast %0 : vector<1x16x8xf32> to vector<16x8xf32>
    %c1_i32 = arith.constant 1 : i32
    %2 = tpu.dynamic_rotate %1 by %c1_i32 dim 0 : vector<16x8xf32>, i32 -> vector<16x8xf32>
    %3 = tpu.iota {dimensions = array<i32: 0>} : vector<16x8xi32>
    %c1_i32_2 = arith.constant 1 : i32
    %4 = vector.broadcast %c1_i32_2 : i32 to vector<16x8xi32>
    %5 = arith.cmpi sge, %3, %4 : vector<16x8xi32>
    %cst = arith.constant 0.000000e+00 : f32
    %6 = vector.broadcast %cst : f32 to vector<16x8xf32>
    %7 = arith.select %5, %2, %6 : vector<16x8xi1>, vector<16x8xf32>
    %c0_3 = arith.constant 0 : index
    %c0_4 = arith.constant 0 : index
    %c0_5 = arith.constant 0 : index
    %8 = vector.load %arg2[%c0_3, %c0_4, %c0_5] : memref<2x8x128xf32, #tpu.memory_space<vmem>>, vector<1x8x128xf32>
    %9 = vector.shape_cast %8 : vector<1x8x128xf32> to vector<8x128xf32>
    %cst_6 = arith.constant dense<0.000000e+00> : vector<16x128xf32>
    %10 = tpu.matmul %7, %9, %cst_6 {dimension_numbers = #tpu.dot_dimension_numbers<[1], [0], [0], [1], [0, 0, 1, 1], [], []>} : vector<16x8xf32>, vector<8x128xf32>, vector<16x128xf32> -> vector<16x128xf32>
    %c1 = arith.constant 1 : index
    %c0_7 = arith.constant 0 : index
    %c0_8 = arith.constant 0 : index
    %11 = vector.load %arg2[%c1, %c0_7, %c0_8] : memref<2x8x128xf32, #tpu.memory_space<vmem>>, vector<1x8x128xf32>
    %12 = vector.shape_cast %11 : vector<1x8x128xf32> to vector<8x128xf32>
    %cst_9 = arith.constant dense<0.000000e+00> : vector<16x128xf32>
    %13 = tpu.matmul %1, %12, %cst_9 {dimension_numbers = #tpu.dot_dimension_numbers<[1], [0], [0], [1], [0, 0, 1, 1], [], []>} : vector<16x8xf32>, vector<8x128xf32>, vector<16x128xf32> -> vector<16x128xf32>
    %14 = arith.addf %10, %13 : vector<16x128xf32>
    %c0_10 = arith.constant 0 : index
    %c0_11 = arith.constant 0 : index
    %15 = vector.load %arg3[%c0_10, %c0_11] : memref<1x128xf32, #tpu.memory_space<vmem>>, vector<1x128xf32>
    %16 = vector.broadcast %15 : vector<1x128xf32> to vector<16x128xf32>
    %17 = arith.addf %14, %16 : vector<16x128xf32>
    %cst_12 = arith.constant 0.000000e+00 : f32
    %18 = vector.broadcast %cst_12 : f32 to vector<16x128xf32>
    %19 = arith.maximumf %17, %18 : vector<16x128xf32>
    %c1_i32_13 = arith.constant 1 : i32
    %20 = tpu.dynamic_rotate %19 by %c1_i32_13 dim 0 : vector<16x128xf32>, i32 -> vector<16x128xf32>
    %21 = tpu.iota {dimensions = array<i32: 0>} : vector<16x128xi32>
    %c1_i32_14 = arith.constant 1 : i32
    %22 = vector.broadcast %c1_i32_14 : i32 to vector<16x128xi32>
    %23 = arith.cmpi sge, %21, %22 : vector<16x128xi32>
    %cst_15 = arith.constant 0.000000e+00 : f32
    %24 = vector.broadcast %cst_15 : f32 to vector<16x128xf32>
    %25 = arith.select %23, %20, %24 : vector<16x128xi1>, vector<16x128xf32>
    %c0_16 = arith.constant 0 : index
    %c0_17 = arith.constant 0 : index
    %c0_18 = arith.constant 0 : index
    %26 = vector.load %arg4[%c0_16, %c0_17, %c0_18] : memref<2x128x128xf32, #tpu.memory_space<vmem>>, vector<1x128x128xf32>
    %27 = vector.shape_cast %26 : vector<1x128x128xf32> to vector<128x128xf32>
    %cst_19 = arith.constant dense<0.000000e+00> : vector<16x128xf32>
    %28 = tpu.matmul %25, %27, %cst_19 {dimension_numbers = #tpu.dot_dimension_numbers<[1], [0], [0], [1], [0, 0, 1, 1], [], []>} : vector<16x128xf32>, vector<128x128xf32>, vector<16x128xf32> -> vector<16x128xf32>
    %c1_20 = arith.constant 1 : index
    %c0_21 = arith.constant 0 : index
    %c0_22 = arith.constant 0 : index
    %29 = vector.load %arg4[%c1_20, %c0_21, %c0_22] : memref<2x128x128xf32, #tpu.memory_space<vmem>>, vector<1x128x128xf32>
    %30 = vector.shape_cast %29 : vector<1x128x128xf32> to vector<128x128xf32>
    %cst_23 = arith.constant dense<0.000000e+00> : vector<16x128xf32>
    %31 = tpu.matmul %19, %30, %cst_23 {dimension_numbers = #tpu.dot_dimension_numbers<[1], [0], [0], [1], [0, 0, 1, 1], [], []>} : vector<16x128xf32>, vector<128x128xf32>, vector<16x128xf32> -> vector<16x128xf32>
    %32 = arith.addf %28, %31 : vector<16x128xf32>
    %c0_24 = arith.constant 0 : index
    %c0_25 = arith.constant 0 : index
    %33 = vector.load %arg5[%c0_24, %c0_25] : memref<1x128xf32, #tpu.memory_space<vmem>>, vector<1x128xf32>
    %34 = vector.broadcast %33 : vector<1x128xf32> to vector<16x128xf32>
    %35 = arith.addf %32, %34 : vector<16x128xf32>
    %cst_26 = arith.constant 0.000000e+00 : f32
    %36 = vector.broadcast %cst_26 : f32 to vector<16x128xf32>
    %37 = arith.maximumf %35, %36 : vector<16x128xf32>
    %c0_27 = arith.constant 0 : index
    %c0_28 = arith.constant 0 : index
    %38 = vector.load %arg6[%c0_27, %c0_28] : memref<8x128xf32, #tpu.memory_space<vmem>>, vector<8x128xf32>
    %cst_29 = arith.constant dense<0.000000e+00> : vector<16x128xf32>
    %39 = tpu.matmul %1, %38, %cst_29 {dimension_numbers = #tpu.dot_dimension_numbers<[1], [0], [0], [1], [0, 0, 1, 1], [], []>} : vector<16x8xf32>, vector<8x128xf32>, vector<16x128xf32> -> vector<16x128xf32>
    %c0_30 = arith.constant 0 : index
    %c0_31 = arith.constant 0 : index
    %40 = vector.load %arg7[%c0_30, %c0_31] : memref<1x128xf32, #tpu.memory_space<vmem>>, vector<1x128xf32>
    %41 = vector.broadcast %40 : vector<1x128xf32> to vector<16x128xf32>
    %42 = arith.addf %39, %41 : vector<16x128xf32>
    %43 = arith.addf %37, %42 : vector<16x128xf32>
    %cst_32 = arith.constant 0.000000e+00 : f32
    %44 = vector.broadcast %cst_32 : f32 to vector<16x128xf32>
    %45 = arith.maximumf %43, %44 : vector<16x128xf32>
    %c0_33 = arith.constant 0 : index
    %c0_34 = arith.constant 0 : index
    %c0_35 = arith.constant 0 : index
    %46 = vector.load %arg8[%c0_33, %c0_34, %c0_35] : memref<1x16x128xf32, #tpu.memory_space<vmem>>, vector<1x16x128xf32>
    %47 = vector.shape_cast %46 : vector<1x16x128xf32> to vector<16x128xf32>
    %48 = vector.shape_cast %45 : vector<16x128xf32> to vector<1x16x128xf32>
    tpu.vector_store %arg8[%c0_33, %c0_34, %c0_35], %48 {strides = array<i32>} : memref<1x16x128xf32, #tpu.memory_space<vmem>>, vector<1x16x128xf32>,
    return
  }
  func.func @transform_0(%arg0: i32) -> (i32, i32, i32) {
    %c0_i32 = arith.constant 0 : i32
    %c0_i32_0 = arith.constant 0 : i32
    %c0_i32_1 = arith.constant 0 : i32
    return %arg0, %c0_i32, %c0_i32_0 : i32, i32, i32
  }
  func.func @transform_1(%arg0: i32) -> (i32, i32, i32) {
    %c0_i32 = arith.constant 0 : i32
    %c0_i32_0 = arith.constant 0 : i32
    %c0_i32_1 = arith.constant 0 : i32
    %c0_i32_2 = arith.constant 0 : i32
    return %c0_i32, %c0_i32_0, %c0_i32_1 : i32, i32, i32
  }
  func.func @transform_2(%arg0: i32) -> (i32, i32) {
    %c0_i32 = arith.constant 0 : i32
    %c0_i32_0 = arith.constant 0 : i32
    %c0_i32_1 = arith.constant 0 : i32
    return %c0_i32, %c0_i32_0 : i32, i32
  }
  func.func @transform_3(%arg0: i32) -> (i32, i32, i32) {
    %c0_i32 = arith.constant 0 : i32
    %c0_i32_0 = arith.constant 0 : i32
    %c0_i32_1 = arith.constant 0 : i32
    %c0_i32_2 = arith.constant 0 : i32
    return %c0_i32, %c0_i32_0, %c0_i32_1 : i32, i32, i32
  }
  func.func @transform_4(%arg0: i32) -> (i32, i32) {
    %c0_i32 = arith.constant 0 : i32
    %c0_i32_0 = arith.constant 0 : i32
    %c0_i32_1 = arith.constant 0 : i32
    return %c0_i32, %c0_i32_0 : i32, i32
  }
  func.func @transform_5(%arg0: i32) -> (i32, i32) {
    %c0_i32 = arith.constant 0 : i32
    %c0_i32_0 = arith.constant 0 : i32
    %c0_i32_1 = arith.constant 0 : i32
    return %c0_i32, %c0_i32_0 : i32, i32
  }
  func.func @transform_6(%arg0: i32) -> (i32, i32) {
    %c0_i32 = arith.constant 0 : i32
    %c0_i32_0 = arith.constant 0 : i32
    %c0_i32_1 = arith.constant 0 : i32
    return %c0_i32, %c0_i32_0 : i32, i32
  }
  func.func @transform_7(%arg0: i32) -> (i32, i32, i32) {
    %c0_i32 = arith.constant 0 : i32
    %c0_i32_0 = arith.constant 0 : i32
    %c0_i32_1 = arith.constant 0 : i32
    return %arg0, %c0_i32, %c0_i32_0 : i32, i32, i32
  }
}

</mosaic_0001>

<bundles_post_ra>
// kernel: tpu_custom_call.1
= control target key start
LH: loop header
LB: loop body
LE: loop exit
PB: predicated region body
PF: predicated region fallthrough
CT: control target
= control target key end

     0   :  { %12 = vsyncpa [#allocation3], 0  ;;  %s1469_s0 = inlined_call_operand.vmem [shape: f32[2,16,8], index: 0, kind: input, shape index: {}]   ;;  %s1470_s1 = inlined_call_operand.vmem [shape: f32[2,8,128], index: 1, kind: input, shape index: {}]   ;;  %s1471_s2 = inlined_call_operand.vmem [shape: f32[1,128], index: 2, kind: input, shape index: {}]   ;;  %s1472_s3 = inlined_call_operand.hbm [shape: f32[2,128,128], index: 3, kind: input, shape index: {}]   ;;  %s1473_s4 = inlined_call_operand.vmem [shape: f32[1,128], index: 4, kind: input, shape index: {}]   ;;  %s1474_s5 = inlined_call_operand.vmem [shape: f32[8,128], index: 5, kind: input, shape index: {}]   ;;  %s1475_s6 = inlined_call_operand.vmem [shape: f32[1,128], index: 6, kind: input, shape index: {}]   ;;  %s1476_s7 = inlined_call_operand.hbm [shape: f32[2,16,128], index: 7, kind: output, shape index: {}]  }
   0x1   :  { %13 = vsyncpa [#allocation4], 0 }
   0x2   :  { %15 = vsyncpa [#allocation4 + $0x1], 0  ;;  %s1281_s24 = smov 0   ;;  %s1283_s25 = smov 0  }
   0x3   :  { %s1285_s26 = smov 0   ;;  %s1287_s27 = smov 0  }
   0x4 LB: > { %s1302_s28 = sadd.s32 4294967295, %s1233_s27   ;;  %s860_s29 = sadd.s32 4294967294, %s1233_s27   ;;  %s1233_s27 = sphi %s1287_s27, %s1492_s27   ;;  %s1229_s26 = sphi %s1285_s26, %s1491_s26   ;;  %s1225_s25 = sphi %s1283_s25, %s1490_s25   ;;  %s1221_s24 = sphi %s1281_s24, %s1489_s24  }
   0x5   : > { %s1306_s30 = sadd.s32 1, %s1233_s27   ;;  %s180_s8 = sadd.s32 1, %s1229_s26 }
   0x6   : > { %s177_s9 = ssub.s32 %s1233_s27, %s1306_s30  ;;  %p190_p0 = scmp.ne.s32.totalorder %s1229_s26, %s1225_s25 }
   0x7   : > { %p178_p1 = scmp.eq.s32.totalorder %s177_s9, 0  ;;  %p191_p2 = scmp.eq.s32.totalorder %s1302_s28, 1 }
   0x8   : > { %p196_p3 = scmp.ne.s32.totalorder %s1225_s25, %s1221_s24  ;;  %p197_p4 = scmp.eq.s32.totalorder %s860_s29, 1 }
   0x9   : > { %s1317_s10 = scalar_select %p178_p1, %s1229_s26, %s180_s8  }
   0xa   : > { %p1319_p5 = por %p191_p2, %p190_p0  ;;  %p1323_p6 = por %p197_p4, %p196_p3 }
   0xb   : > { %p861_p7 = scmp.ge.s32.totalorder %s1233_s27, 1  ;;  %p204_p8 = scmp.lt.s32.totalorder %s1233_s27, 3 }
   0xc   : > { %s1480_s11 = scalar_select %p1319_p5, 1, 0 }
   0xd   : > { %s1481_s12 = scalar_select %p1323_p6, 1, 0 }
   0xe   : > { %p1477_p9 = scmp.eq.s32.totalorder %s1302_s28, 0  ;;  %p1330_p10 = pnand %p861_p7, %p204_p8 }
   0xf   : > { %s1235_s14 = smov [#allocation2]   ;;  %s1139_s19 = scalar_lea.hbm %s1472_s3, 4096 }
  0x10   : > { %s1482_s13 = scalar_select %p1330_p10, 1, 0 }
  0x11   : > { %s222_s15 = sshll.u32 %s1235_s14, 4  ;;  %p1091_p11 = pneg %p1330_p10  ;;  %s223_s15 = int_to_ptr.vmem [resolvable:$true] %s222_s15 }
  0x12   : > { %p1140_p13 = scmp.ne.s32.totalorder %s1472_s3, %s1139_s19  ;;  %p1146_p3 = scmp.lt.u32.totalorder %s1139_s19, %s1472_s3 }
  0x13   : > { %p1338_p12 = pnand %p1477_p9, %p1091_p11 }
  0x15   : > { %p1141_p0 = pneg %p1338_p12 }
  0x17   : > { %p1142_p1 = pnand %p1141_p0, %p1140_p13 }
  0x19   : > { %p1143_p2 = pneg %p1142_p1 }
  0x1b   : > { %p1148_p4 = pnand %p1146_p3, %p1143_p2 }
  0x1d   : > { %1151 = shalt.err (!%p1148_p4)
}
  0x1e   : > { %s1152_s29 = scalar_lea.vmem %s223_s15, 4096  ;;  %p1160_p9 = scmp.lt.s32.totalorder %s223_s15, %s223_s15 }
  0x1f   : > { %p1153_p7 = scmp.ne.s32.totalorder %s223_s15, %s1152_s29  ;;  %p1161_p6 = scmp.lt.s32.totalorder %s1152_s29, %s1152_s29 }
  0x21   : > { %p1155_p8 = pnand %p1153_p7, %p1141_p0  ;;  %p1162_p5 = por %p1161_p6, %p1160_p9 }
  0x23   : > { %p1156_p11 = pneg %p1155_p8 }
  0x25   : > { %p1163_p10 = pnand %p1162_p5, %p1156_p11 }
  0x27   : > { %1166 = shalt.err (!%p1163_p10)
}
  0x28   : > { %s1236_s8 = smov 128   ;;  %s1237_s9 = smov 8  }
  0x29   : > { %1094 = dma.hbm_to_vmem [thread:$0]  (!%p1338_p12), %s1472_s3, 4096, %s223_s15, [#allocation3], %s1236_s8, %s1236_s8, %s1237_s9  }
  0x2a   : > { %p1484_p13 = scmp.ne.s32.totalorder %s1482_s13, 0 }
  0x2b   : > { %p1485_p1 = scmp.eq.s32.totalorder (!%p1484_p13), %s1302_s28, 0 }
  0x2c   : > { %255 = sbr.rel (%p1484_p13) target bundleno = 525 (0x20d), region = 48 }
  0x33   : > { %1212 = dma.done.wait (%p1485_p1), [#allocation3], 4096   ;;  %p1486_p0 = pmov %p1485_p1 }
  0x34   : > { %p287_p5 = scmp.lt.s32.totalorder %s1302_s28, 1  ;;  %v296_v0 = vlaneseq  ;;  %vm309_vm0 = vcmask 64512   ;;  %v869_v2 = vld [vmem:[%s1470_s1 + $0x8] sm:$0xff]  ;;  %v306_v4 = vld [vmem:[%s1470_s1] sm:$0xff]  ;;  %v508_v13 = vld [vmem:[#allocation2 + $0x90] sm:$0xff]  ;;  %s284_s17 = sand.u32 1, %s1225_s25  }
  0x35   : > { %1214 = vsyncadd (%p1486_p0), [#allocation3], 4294963200  ;;  %932 = vmatprep.subr.mxu1 %v869_v2  ;;  %v506_v7 = vld [vmem:[#allocation2 + $0x80] sm:$0xff]  ;;  %v507_v8 = vld [vmem:[#allocation2 + $0x88] sm:$0xff]  ;;  %937 = vmatprep.subr.mxu0 %v306_v4  ;;  %s866_s16 = sshll.u32 %s284_s17, 4  ;;  %s886_s22 = sshll.u32 %s1302_s28, 8 }
  0x36   : > { %s288_s18 = scalar_select %p287_p5, %s1302_s28, 1  ;;  %v1366_v1 = vshrl.u32 %v296_v0, 7  ;;  %933 = vmatpush3.msra.mxu1 %v869_v2  ;;  %v1017_v10 = vpack.c.bf16 %v507_v8, %v506_v7  ;;  %v489_v11 = vld [vmem:[#allocation2] sm:$0xff]  ;;  %v490_v12 = vld [vmem:[#allocation2 + $0x8] sm:$0xff]  ;;  %938 = vmatpush3.msra.mxu0 %v306_v4  ;;  %v509_v15 = vld [vmem:[#allocation2 + $0x98] sm:$0xff] }
  0x37   : > { %v1049_v14 = vpack.c.bf16 %v490_v12, %v489_v11  ;;  %v491_v16 = vld [vmem:[#allocation2 + $0x10] sm:$0xff]  ;;  %v492_v17 = vld [vmem:[#allocation2 + $0x18] sm:$0xff]  ;;  %v493_v21 = vld [vmem:[#allocation2 + $0x20] sm:$0xff]  ;;  %v1021_v23 = vpack.c.bf16 %v509_v15, %v508_v13  ;;  %s286_s13 = scalar_lea.vmem [#allocation5], %s866_s16  ;;  %s1426_s8 = scalar_lea.hbm %s1476_s7, %s886_s22 }
  0x38   : > { %s885_s19 = sshll.u32 %s288_s18, 4  ;;  %vm298_vm1 = vcmp.lt.s32.totalorder %v1366_v1, 1  ;;  %vm302_vm2 = vcmp.ge.s32.totalorder %v1366_v1, 1  ;;  %1018 = vmatprep.subr.bf16.mxu0 %v1017_v10  ;;  %v1053_v20 = vpack.c.bf16 %v492_v17, %v491_v16  ;;  %v494_v24 = vld [vmem:[#allocation2 + $0x28] sm:$0xff]  ;;  %v510_v25 = vld [vmem:[#allocation2 + $0xa0] sm:$0xff]  ;;  %v495_v28 = vld [vmem:[#allocation2 + $0x30] sm:$0xff] }
  0x39   : > { %s291_s15 = scalar_lea.vmem %s1469_s0, %s885_s19  ;;  %1050 = vmatprep.subr.bf16.mxu1 %v1049_v14  ;;  %v511_v26 = vld [vmem:[#allocation2 + $0xa8] sm:$0xff]  ;;  %v1057_v27 = vpack.c.bf16 %v494_v24, %v493_v21  ;;  %v496_v29 = vld [vmem:[#allocation2 + $0x38] sm:$0xff]  ;;  %v512_v31 = vld [vmem:[#allocation2 + $0xb0] sm:$0xff]  ;;  %s786_s21 = sshll.u32 %s286_s13, 4  ;;  %s1421_s21 = int_to_ptr.vmem [resolvable:$true] %s786_s21 }
  0x3a   : > { %v1374_v3 = vld [vmem:[%s291_s15] sm:$0xff]  ;;  %v1382_v6 = vld [vmem:[%s291_s15 + $0x8] sm:$0xff]  ;;  %v1025_v30 = vpack.c.bf16 %v511_v26, %v510_v25  ;;  %v513_v32 = vld [vmem:[#allocation2 + $0xb8] sm:$0xff]  ;;  %v1061_v33 = vpack.c.bf16 %v496_v29, %v495_v28  ;;  %s1428_s9 = scalar_lea.sflag [#allocation4], %s284_s17  ;;  %s1167_s14 = scalar_lea.vmem %s1421_s21, 256 }
  0x3b   : > { %v294_v5 = vrot.slane %v1374_v3, 7  ;;  %934 = vmatprep.mubr.msk.f32.mxu1 %vm309_vm0, %v1374_v3  ;;  %v295_v9 = vrot.slane %v1382_v6, 7  ;;  %v497_v34 = vld [vmem:[#allocation2 + $0x40] sm:$0xff]  ;;  %v498_v35 = vld [vmem:[#allocation2 + $0x48] sm:$0xff]  ;;  %v1029_v36 = vpack.c.bf16 %v513_v32, %v512_v31  ;;  %v516_v41 = vld [vmem:[#allocation2 + $0xd0] sm:$0xff]  ;;  %p1168_p6 = scmp.ne.s32.totalorder %s1421_s21, %s1167_s14  ;;  %p1487_p9 = scmp.ne.s32.totalorder %s1480_s11, 0 }
  0x3c   : > { %935 = vmatmul.mubr.msk.f32.vlgmr.msra.gmra.mrb[0].mxu1 %vm309_vm0, %v1382_v6  ;;  %v514_v37 = vld [vmem:[#allocation2 + $0xc0] sm:$0xff]  ;;  %v515_v38 = vld [vmem:[#allocation2 + $0xc8] sm:$0xff]  ;;  %v1065_v39 = vpack.c.bf16 %v498_v35, %v497_v34  ;;  %v517_v42 = vld [vmem:[#allocation2 + $0xd8] sm:$0xff]  ;;  %s1238_s28 = smov [#allocation5]  }
  0x3d   : > { %v300_v18 = vsel %vm298_vm1, %v295_v9, %v294_v5  ;;  %v299_v19 = vsel %vm298_vm1, %v294_v5, %v295_v9  ;;  %1052 = vmatpush3.bf16.msra.mxu1 %v1049_v14  ;;  %v1033_v40 = vpack.c.bf16 %v515_v38, %v514_v37  ;;  %v1037_v43 = vpack.c.bf16 %v517_v42, %v516_v41  ;;  %v499_v44 = vld [vmem:[#allocation2 + $0x50] sm:$0xff]  ;;  %v500_v45 = vld [vmem:[#allocation2 + $0x58] sm:$0xff]  ;;  %v518_v47 = vld [vmem:[#allocation2 + $0xe0] sm:$0xff]  ;;  %p1169_p10 = pnand %p1168_p6, %p1487_p9  ;;  %s1171_s18 = sshll.u32 %s1238_s28, 4  ;;  %s1172_s18 = int_to_ptr.vmem [resolvable:$false] %s1171_s18 }
  0x3e   : > { %v304_v22 = vsel %vm302_vm2, %v300_v18, 0.0  ;;  %1054 = vmatprep.subr.bf16.mxu1 %v1053_v20  ;;  %v1069_v46 = vpack.c.bf16 %v500_v45, %v499_v44  ;;  %v519_v48 = vld [vmem:[#allocation2 + $0xe8] sm:$0xff]  ;;  %v501_v50 = vld [vmem:[#allocation2 + $0x60] sm:$0xff]  ;;  %v520_v53 = vld [vmem:[#allocation2 + $0xf0] sm:$0xff]  ;;  %s1173_s19 = scalar_lea.vmem %s1172_s18, 512  ;;  %p1174_p2 = scmp.lt.s32.totalorder %s1421_s21, %s1172_s18 }
  0x3f   : > { %939 = vmatprep.mubr.msk.f32.mxu0 %vm309_vm0, %v304_v22  ;;  %v1041_v49 = vpack.c.bf16 %v519_v48, %v518_v47  ;;  %v502_v51 = vld [vmem:[#allocation2 + $0x68] sm:$0xff]  ;;  %v521_v54 = vld [vmem:[#allocation2 + $0xf8] sm:$0xff]  ;;  %v503_v56 = vld [vmem:[#allocation2 + $0x70] sm:$0xff]  ;;  %p1170_p12 = pneg %p1169_p10  ;;  %p1175_p3 = scmp.lt.s32.totalorder %s1173_s19, %s1167_s14 }
  0x40   : > { %940 = vmatmul.mubr.msk.f32.vlgmr.msra.gmra.mrb[0].mxu0 %vm309_vm0, %v299_v19  ;;  %v1073_v52 = vpack.c.bf16 %v502_v51, %v501_v50  ;;  %v1045_v55 = vpack.c.bf16 %v521_v54, %v520_v53  ;;  %v504_v57 = vld [vmem:[#allocation2 + $0x78] sm:$0xff]  ;;  %v683_v59 = vld [vmem:[%s1474_s5] sm:$0xff] }
  0x41   : > { %1020 = vmatpush3.bf16.msra.mxu0 %v1017_v10  ;;  %1056 = vmatpush3.bf16.msra.mxu1 %v1053_v20  ;;  %v1077_v58 = vpack.c.bf16 %v504_v57, %v503_v56  ;;  %v874_v63 = vld [vmem:[%s1471_s2] ss:$0 sm:$0xff]  ;;  %p1176_p4 = por %p1175_p3, %p1174_p2 }
  0x42   : > { %1022 = vmatprep.subr.bf16.mxu0 %v1021_v23  ;;  %1058 = vmatprep.subr.bf16.mxu1 %v1057_v27  ;;  %v876_v17 = vld [vmem:[%s1473_s4] ss:$0 sm:$0xff] }
  0x43   : > { %p1177_p7 = pnand %p1176_p4, %p1170_p12 }
  0x45   : > { %1024 = vmatpush3.bf16.msra.mxu0 %v1021_v23  ;;  %1060 = vmatpush3.bf16.msra.mxu1 %v1057_v27 }
  0x46   : > { %1026 = vmatprep.subr.bf16.mxu0 %v1025_v30  ;;  %1062 = vmatprep.subr.bf16.mxu1 %v1061_v33 }
  0x49   : > { %1028 = vmatpush3.bf16.msra.mxu0 %v1025_v30  ;;  %1064 = vmatpush3.bf16.msra.mxu1 %v1061_v33 }
  0x4a   : > { %1030 = vmatprep.subr.bf16.mxu0 %v1029_v36  ;;  %1066 = vmatprep.subr.bf16.mxu1 %v1065_v39 }
  0x4d   : > { %1032 = vmatpush3.bf16.msra.mxu0 %v1029_v36  ;;  %1068 = vmatpush3.bf16.msra.mxu1 %v1065_v39 }
  0x4e   : > { %1034 = vmatprep.subr.bf16.mxu0 %v1033_v40  ;;  %1070 = vmatprep.subr.bf16.mxu1 %v1069_v46 }
  0x51   : > { %1036 = vmatpush3.bf16.msra.mxu0 %v1033_v40  ;;  %1072 = vmatpush3.bf16.msra.mxu1 %v1069_v46 }
  0x52   : > { %1038 = vmatprep.subr.bf16.mxu0 %v1037_v43  ;;  %1074 = vmatprep.subr.bf16.mxu1 %v1073_v52 }
  0x55   : > { %1040 = vmatpush3.bf16.msra.mxu0 %v1037_v43  ;;  %1076 = vmatpush3.bf16.msra.mxu1 %v1073_v52 }
  0x56   : > { %1042 = vmatprep.subr.bf16.mxu0 %v1041_v49  ;;  %1078 = vmatprep.subr.bf16.mxu1 %v1077_v58 }
  0x59   : > { %1044 = vmatpush3.bf16.msra.mxu0 %v1041_v49  ;;  %1080 = vmatpush3.bf16.msra.mxu1 %v1077_v58 }
  0x5a   : > { %1046 = vmatprep.subr.bf16.mxu0 %v1045_v55 }
  0x5d   : > { %1048 = vmatpush3.bf16.msra.mxu0 %v1045_v55 }
  0x5e   : > { %1012 = vmatprep.subr.mxu0 %v683_v59 }
 0x10f   : > { %v936_v60 = vpop.f32.mrb[0].mxu1 }
 0x110   : > { %v382_v61 = vpop.f32.mrb[1].mxu1 }
 0x113   : > { %v941_v62 = vpop.f32.mrb[0].mxu0 }
 0x114   : > { %v469_v0 = vadd.f32 %v941_v62, %v936_v60  ;;  %v463_v2 = vpop.f32.mrb[1].mxu0 }
 0x115   : > { %v464_v4 = vadd.f32 %v463_v2, %v382_v61 }
 0x116   : > { %v480_v5 = vadd.f32 %v874_v63, %v469_v0 }
 0x117   : > { %v479_v7 = vadd.f32 %v874_v63, %v464_v4 }
 0x118   : > { %v482_v8 = vmax.f32 %v480_v5, 0.0 }
 0x119   : > { %v481_v9 = vmax.f32 %v479_v7, 0.0 }
 0x11a   : > { %v484_v10 = vrot.slane %v482_v8, 7 }
 0x11b   : > { %v483_v11 = vrot.slane %v481_v9, 7  ;;  %974 = vmatprep.mubr.f32.mxu0 %v481_v9 }
 0x11c   : > { %975 = vmatmul.mubr.f32.vlgmr.msra.gmra.mrb[2].mxu0 %v482_v8 }
 0x11d   : > { %v486_v12 = vsel %vm298_vm1, %v484_v10, %v483_v11  ;;  %v485_v13 = vsel %vm298_vm1, %v483_v11, %v484_v10  ;;  %1013 = vmatpush3.msra.mxu0 %v683_v59  ;;  %1014 = vmatprep.mubr.msk.f32.mxu0 %vm309_vm0, %v1374_v3  ;;  %v877_v3 = vld [vmem:[%s1475_s6] ss:$0 sm:$0xff] }
 0x11e   : > { %1009 = vmatprep.mubr.msk.f32.mxu1 %vm302_vm2, %v486_v12 }
 0x11f   : > { %1010 = vmatmul.mubr.f32.vlgmr.msra.gmra.mrb[2].mxu1 %v485_v13 }
 0x120   : > { %1015 = vmatmul.mubr.msk.f32.vlgmr.msra.gmra.mrb[4].mxu0 %vm309_vm0, %v1382_v6 }
 0x1ef   : > { %v976_v14 = vpop.f32.mrb[2].mxu0 }
 0x1f0   : > { %v588_v15 = vpop.f32.mrb[3].mxu0 }
 0x1f2   : > { %v1011_v16 = vpop.f32.mrb[2].mxu1 }
 0x1f3   : > { %v669_v1 = vadd.f32 %v1011_v16, %v976_v14  ;;  %v663_v18 = vpop.f32.mrb[3].mxu1  ;;  %v1016_v19 = vpop.f32.mrb[4].mxu0 }
 0x1f4   : > { %v664_v20 = vadd.f32 %v663_v18, %v588_v15  ;;  %v757_v21 = vpop.f32.mrb[5].mxu0  ;;  %v763_v22 = vadd.f32 %v1016_v19, %v877_v3 }
 0x1f5   : > { %v680_v6 = vadd.f32 %v876_v17, %v669_v1  ;;  %v758_v24 = vadd.f32 %v877_v3, %v757_v21 }
 0x1f6   : > { %v679_v23 = vadd.f32 %v876_v17, %v664_v20 }
 0x1f7   : > { %v682_v25 = vmax.f32 %v680_v6, 0.0 }
 0x1f8   : > { %v681_v26 = vmax.f32 %v679_v23, 0.0 }
 0x1f9   : > { %v767_v27 = vadd.f32 %v763_v22, %v682_v25 }
 0x1fa   : > { %v766_v28 = vadd.f32 %v758_v24, %v681_v26 }
 0x1fb   : > { %v769_v29 = vmax.f32 %v767_v27, 0.0 }
 0x1fc   : > { %v768_v30 = vmax.f32 %v766_v28, 0.0 }
 0x1fd   : > { %771 = vst [vmem:[%s286_s13 + $0x8] sm:$0xff] %v769_v29 }
 0x1fe   : > { %770 = vst [vmem:[%s286_s13] sm:$0xff] %v768_v30 }
 0x1ff   : > { %1180 = shalt.err (!%p1177_p7)
}
 0x200   : > { %s1181_s17 = scalar_lea.hbm %s1426_s8, 256  ;;  %s1185_s15 = scalar_lea.hbm %s1476_s7, 512 }
 0x201   : > { %p1182_p8 = scmp.ne.s32.totalorder %s1426_s8, %s1181_s17  ;;  %p1186_p1 = scmp.lt.u32.totalorder %s1426_s8, %s1476_s7 }
 0x202   : > { %p1187_p0 = scmp.lt.u32.totalorder %s1185_s15, %s1181_s17  ;;  %p1189_p6 = scmp.lt.u32.totalorder %s1181_s17, %s1426_s8 }
 0x203   : > { %p1183_p11 = pnand %p1182_p8, %p1487_p9 }
 0x204   : > { %p1188_p5 = por %p1187_p0, %p1186_p1 }
 0x205   : > { %p1184_p13 = pneg %p1183_p11 }
 0x206   : > { %p1190_p10 = por %p1189_p6, %p1188_p5 }
 0x208   : > { %p1191_p12 = pnand %p1190_p10, %p1184_p13 }
 0x20a   : > { %1194 = shalt.err (!%p1191_p12)
}
 0x20b   : > { %s1239_s23 = smov 128   ;;  %s1240_s29 = smov 8  }
 0x20c   : > { %1089 = dma.vmem_to_hbm [thread:$0]  (%p1487_p9), %s1421_s21, 256, %s1426_s8, %s1428_s9, %s1239_s23, %s1239_s23, %s1240_s29  }
 0x20d PF: > { %p1101_p2 = scmp.ge.s32.totalorder %s1233_s27, 2  ;;  %s801_s14 = sand.u32 1, %s1221_s24  }
 0x20e   : > { %p1488_p3 = scmp.ne.s32.totalorder %s1481_s12, 0  ;;  %s802_s28 = scalar_lea.sflag [#allocation4], %s801_s14 }
 0x210   : > { %p1096_p4 = pnand %p1101_p2, %p1488_p3 }
 0x212   : > { %1216 = dma.done.wait (!%p1096_p4), %s802_s28, 256  }
 0x213   : > { %1218 = vsyncadd (!%p1096_p4), %s802_s28, 4294967040  ;;  %p18_p7 = scmp.ge.s32.totalorder %s1306_s30, 4   ;;  %s1489_s24 = smov %s1225_s25 }
 0x214   : > { %s1490_s25 = smov %s1229_s26  ;;  %s1491_s26 = smov %s1317_s10 }
 0x215   : > { %s1492_s27 = smov %s1306_s30  ;;  %20 = sbr.rel (!%p18_p7) target bundleno = 4 (0x4), region = 90 }
 0x21c   :  { %807 = vsyncpa [#allocation3], 1 }
 0x21d   :  { %809 = vsyncpa [#allocation3 + $0x1], 1 }
 0x21e   :  { %810 = vsyncpa [#allocation4], 1 }
 0x21f   :  { %812 = vsyncpa [#allocation4 + $0x1], 1 }

</bundles_post_ra>
